<compile_context>
chip_gen: v7x
topology: tpu7x:2x2x1
jax: 0.10.0
libtpu: 0.0.40
codegen_flags: <defaults>
</compile_context>

<pallas_src>
import functools

import jax
import jax.numpy as jnp
from jax.experimental import pallas as pl
from jax.experimental.pallas import tpu as pltpu


_LANE = 128
_TARGET_BLOCK_IN_BYTES = 8 * 1024 * 1024   # aim for a few-MiB input block per grid step


def _round_up(x, m):
    return (x + m - 1) // m * m


def _sublane_multiple(itemsize):
    # f32 -> 8 rows per vreg, bf16/fp16 -> 16, int8/fp8 -> 32.
    return max(8, 32 // max(int(itemsize), 1))


def _budgets():
    """(block_budget_bytes, vmem_limit_bytes) derived from the chip's VMEM."""
    phys = 0
    try:
        info = pltpu.get_tpu_info()
        phys = int(getattr(info, "vmem_capacity_bytes", 0) or 0)
    except Exception:
        phys = 0
    if phys <= 0:
        phys = 64 * 1024 * 1024  # unknown chip: assume the smallest (v7x-sized) VMEM
    if phys >= 128 * 1024 * 1024:
        # v5e / v6e: 128 MiB physical VMEM per TensorCore.
        return 64 * 1024 * 1024, 100 * 1024 * 1024
    # v7x: 64 MiB physical -- keep a wide safety margin (spills hurt more than
    # a slightly smaller block).
    return 22 * 1024 * 1024, 44 * 1024 * 1024


# --------------------------- single-pass kernel ---------------------------

def _norm_rows_kernel(x_ref, o_ref, *, eps, inv_n):
    """One grid step holds R complete sample rows: block (R, N) resident in VMEM."""
    x = x_ref[...].astype(jnp.float32)
    # Block is VMEM-resident: two sweeps (mean, then centered var) cost ~nothing
    # extra and avoid the E[x^2]-mean^2 cancellation.
    mean = jnp.sum(x, axis=-1, keepdims=True) * inv_n
    xc = x - mean
    var = jnp.sum(xc * xc, axis=-1, keepdims=True) * inv_n
    rstd = jax.lax.rsqrt(var + eps)                   # EUP slot (essentially free)
    o_ref[...] = (xc * rstd).astype(o_ref.dtype)


# --------------------------- two-pass kernels ------------------------------

def _stats_kernel(x_ref, mean_ref, rstd_ref, sum_sc, sq_sc, *,
                  eps, inv_n, n, tn, mask_cols):
    """Pass 1: accumulate per-row sum / sumsq over feature tiles -> mean, rstd."""
    j = pl.program_id(1)
    j_last = pl.num_programs(1) - 1

    @pl.when(j == 0)
    def _():
        sum_sc[...] = jnp.zeros_like(sum_sc)
        sq_sc[...] = jnp.zeros_like(sq_sc)

    x = x_ref[...].astype(jnp.float32)

    if mask_cols:
        # Pay the iota/compare/select only on the single ragged tile.
        @pl.when(j < j_last)
        def _():
            sum_sc[...] += jnp.sum(x, axis=-1, keepdims=True)
            sq_sc[...] += jnp.sum(x * x, axis=-1, keepdims=True)

        @pl.when(j == j_last)
        def _():
            col = jax.lax.broadcasted_iota(jnp.int32, x.shape, 1) + j * tn
            valid = col < n
            # select (not multiply) so padded NaN/Inf bytes cannot leak in.
            sum_sc[...] += jnp.sum(jnp.where(valid, x, 0.0), axis=-1, keepdims=True)
            sq_sc[...] += jnp.sum(jnp.where(valid, x * x, 0.0), axis=-1, keepdims=True)
    else:
        sum_sc[...] += jnp.sum(x, axis=-1, keepdims=True)
        sq_sc[...] += jnp.sum(x * x, axis=-1, keepdims=True)

    @pl.when(j == j_last)
    def _():
        mean = sum_sc[...] * inv_n
        var = jnp.maximum(sq_sc[...] * inv_n - mean * mean, 0.0)  # clamp rounding negatives
        mean_ref[...] = mean
        rstd_ref[...] = jax.lax.rsqrt(var + eps)


def _apply_kernel(x_ref, mean_ref, rstd_ref, o_ref):
    """Pass 2: normalize a lane-dense (R, TN) tile with broadcast per-row stats."""
    x = x_ref[...].astype(jnp.float32)
    o_ref[...] = ((x - mean_ref[...]) * rstd_ref[...]).astype(o_ref.dtype)


# --------------------------- wrapper ---------------------------------------

def adaptive_fullstack_norm(x, eps=1e-5, *, _force_two_pass=False, _force_tile_n=None):
    """x: any shape (B, ...). Returns normalized tensor of the same shape/dtype."""
    original_shape = x.shape
    b = int(original_shape[0])
    n = 1
    for d in original_shape[1:]:
        n *= int(d)
    x2 = x.reshape(b, n)

    block_budget, vmem_limit = _budgets()
    itemsize = jnp.dtype(x.dtype).itemsize
    sub = _sublane_multiple(itemsize)
    # Per-element VMEM cost of one resident block: double-buffered in + out
    # plus ~3 f32 temporaries (f32 copy of x, centered copy, f32 result).
    bpe = 4 * itemsize + 12
    max_rows = block_budget // max(1, n * bpe)

    if not _force_two_pass and max_rows >= min(b, sub):
        # ---------------- single-pass path: full rows resident in VMEM ----------------
        if b <= sub:
            r = b  # tiny batch: single full-extent block, grid=(1,)
        else:
            # Largest row count the VMEM budget allows.
            r_vmem = max(sub, (max_rows // sub) * sub)
            # Cap so each *input* block is only a few MiB (pipelining sweet spot).
            r_bytes = max(sub, (_TARGET_BLOCK_IN_BYTES // max(1, n * itemsize)) // sub * sub)
            r = min(r_vmem, r_bytes)
            # Ensure several grid steps: hides DMA behind compute and gives v7x
            # a balanced, multi-step "parallel" axis to shard across its 2 TCs.
            desired_steps = min(8, pl.cdiv(b, sub))
            r_cap = max(sub, (b // desired_steps) // sub * sub)
            r = max(sub, min(r, r_cap))

        out = pl.pallas_call(
            functools.partial(_norm_rows_kernel, eps=float(eps), inv_n=1.0 / float(n)),
            out_shape=jax.ShapeDtypeStruct((b, n), x.dtype),
            grid=(pl.cdiv(b, r),),
            in_specs=[pl.BlockSpec((r, n), lambda i: (i, 0))],
            out_specs=pl.BlockSpec((r, n), lambda i: (i, 0)),
            compiler_params=pltpu.CompilerParams(
                dimension_semantics=("parallel",),
                vmem_limit_bytes=vmem_limit,
            ),
        )(x2)
        return out.reshape(original_shape)

    # ---------------- two-pass path: rows too large for VMEM; tile features ----------------
    tn = _force_tile_n if _force_tile_n is not None else min(_round_up(n, _LANE), 32 * 1024)
    while sub * tn * bpe > block_budget and tn > _LANE:
        tn = max(_LANE, _round_up(tn // 2, _LANE))
    if b <= sub:
        r2 = b  # full-extent row block
    else:
        r2 = max(sub, (block_budget // max(1, tn * bpe)) // sub * sub)
        r2 = min(r2, _round_up(b, sub))
        if b >= 2 * sub:
            # Keep >= 2 row-blocks so the parallel axis can be shared across
            # v7x's two TensorCores with balanced work.
            r2 = min(r2, max(sub, (b // 2) // sub * sub))
    nr = pl.cdiv(b, r2)
    nc = pl.cdiv(n, tn)
    mask_cols = (n % tn) != 0

    # Pass 1: per-row sum / sum-of-squares -> mean, rstd.
    mean, rstd = pl.pallas_call(
        functools.partial(_stats_kernel, eps=float(eps), inv_n=1.0 / float(n),
                          n=n, tn=tn, mask_cols=mask_cols),
        out_shape=(jax.ShapeDtypeStruct((b, 1), jnp.float32),
                   jax.ShapeDtypeStruct((b, 1), jnp.float32)),
        grid=(nr, nc),
        in_specs=[pl.BlockSpec((r2, tn), lambda i, j: (i, j))],
        out_specs=(pl.BlockSpec((r2, 1), lambda i, j: (i, 0)),
                   pl.BlockSpec((r2, 1), lambda i, j: (i, 0))),
        scratch_shapes=[pltpu.VMEM((r2, 1), jnp.float32),
                        pltpu.VMEM((r2, 1), jnp.float32)],
        compiler_params=pltpu.CompilerParams(
            dimension_semantics=("parallel", "arbitrary"),
            vmem_limit_bytes=vmem_limit,
        ),
    )(x2)

    # Pass 2: normalize with the per-row stats (pure streaming, lane-dense tiles).
    out = pl.pallas_call(
        _apply_kernel,
        out_shape=jax.ShapeDtypeStruct((b, n), x.dtype),
        grid=(nr, nc),
        in_specs=[pl.BlockSpec((r2, tn), lambda i, j: (i, j)),
                  pl.BlockSpec((r2, 1), lambda i, j: (i, 0)),
                  pl.BlockSpec((r2, 1), lambda i, j: (i, 0))],
        out_specs=pl.BlockSpec((r2, tn), lambda i, j: (i, j)),
        compiler_params=pltpu.CompilerParams(
            dimension_semantics=("parallel", "parallel"),
            vmem_limit_bytes=vmem_limit,
        ),
    )(x2, mean, rstd)
    return out.reshape(original_shape)


# --------------------------- reference & tests ------------------------------

def _reference(x, eps=1e-5):
    original_shape = x.shape
    xf = x.reshape(x.shape[0], -1).astype(jnp.float32)
    mean = jnp.mean(xf, axis=1, keepdims=True)
    var = jnp.mean((xf - mean) ** 2, axis=1, keepdims=True)
    y = (xf - mean) / jnp.sqrt(var + eps)
    return y.reshape(original_shape).astype(x.dtype)


def _check(x, eps=1e-5, tol=1e-4, **kw):
    y = jax.block_until_ready(adaptive_fullstack_norm(x, eps=eps, **kw))
    y_ref = _reference(x, eps=eps)
    assert y.shape == x.shape and y.dtype == x.dtype
    err = jnp.max(jnp.abs(y.astype(jnp.float32) - y_ref.astype(jnp.float32)))
    assert err < tol, f"mismatch vs reference: {err}"


if __name__ == "__main__":
    key = jax.random.PRNGKey(0)
    k1, k2, k3, k4, k5 = jax.random.split(key, 5)

    # Primary config: NCHW conv-stack activation (single full-extent block).
    x = jax.random.normal(k1, (2, 4, 16, 16), dtype=jnp.float32) * 3.0 + 1.5
    _check(x)

    # Odd, non-128-multiple feature count (full-extent block path).
    _check(jax.random.normal(k2, (10, 3, 7, 5), dtype=jnp.float32) * 2.0 - 0.7)

    # Larger batch: multi-row blocks with a ragged last row block.
    _check(jax.random.normal(k3, (20, 2, 8, 16), dtype=jnp.float32) + 0.3)

    # Large-N fallback (two-pass), forced at small size: tiled feature axis.
    _check(jax.random.normal(k4, (16, 4, 8, 8), dtype=jnp.float32) * 1.7,
           _force_two_pass=True, _force_tile_n=128)

    # Two-pass with ragged feature tiles (masking only on the last tile).
    _check(jax.random.normal(k5, (16, 4, 9, 9), dtype=jnp.float32) - 1.2,
           _force_two_pass=True, _force_tile_n=128)

    print("KERNEL_OK")
</pallas_src>

<mosaic_0001>
module attributes {stable_mosaic.version = 11 : i64} {
  func.func @_norm_rows_kernel(%arg0: i32, %arg1: memref<2x1024xf32, #tpu.memory_space<vmem>>, %arg2: memref<2x1024xf32, #tpu.memory_space<vmem>>) attributes {dimension_semantics = [#tpu.dimension_semantics<parallel>], iteration_bounds = array<i64: 1>, scalar_prefetch = 0 : i64, scratch_operands = 0 : i64, tpu.core_type = #tpu.core_type<tc>, window_params = [{transform_indices = @transform_0, window_bounds = array<i64: 2, 1024>}, {transform_indices = @transform_1, window_bounds = array<i64: 2, 1024>}]} {
    %c0 = arith.constant 0 : index
    %c0_0 = arith.constant 0 : index
    %0 = vector.load %arg1[%c0, %c0_0] : memref<2x1024xf32, #tpu.memory_space<vmem>>, vector<2x1024xf32>
    %cst = arith.constant dense<0.000000e+00> : vector<2xf32>
    %1 = vector.multi_reduction <add>, %0, %cst [1] : vector<2x1024xf32> to vector<2xf32>
    %2 = vector.shape_cast %1 : vector<2xf32> to vector<2x1xf32>
    %cst_1 = arith.constant 9.765625E-4 : f32
    %3 = vector.broadcast %cst_1 : f32 to vector<2x1xf32>
    %4 = arith.mulf %2, %3 : vector<2x1xf32>
    %5 = vector.broadcast %4 : vector<2x1xf32> to vector<2x1024xf32>
    %6 = arith.subf %0, %5 : vector<2x1024xf32>
    %7 = arith.mulf %6, %6 : vector<2x1024xf32>
    %cst_2 = arith.constant dense<0.000000e+00> : vector<2xf32>
    %8 = vector.multi_reduction <add>, %7, %cst_2 [1] : vector<2x1024xf32> to vector<2xf32>
    %9 = vector.shape_cast %8 : vector<2xf32> to vector<2x1xf32>
    %cst_3 = arith.constant 9.765625E-4 : f32
    %10 = vector.broadcast %cst_3 : f32 to vector<2x1xf32>
    %11 = arith.mulf %9, %10 : vector<2x1xf32>
    %cst_4 = arith.constant 9.99999974E-6 : f32
    %12 = vector.broadcast %cst_4 : f32 to vector<2x1xf32>
    %13 = arith.addf %11, %12 : vector<2x1xf32>
    %14 = math.rsqrt %13 : vector<2x1xf32>
    %15 = vector.broadcast %14 : vector<2x1xf32> to vector<2x1024xf32>
    %16 = arith.mulf %6, %15 : vector<2x1024xf32>
    %c0_5 = arith.constant 0 : index
    %c0_6 = arith.constant 0 : index
    %17 = vector.load %arg2[%c0_5, %c0_6] : memref<2x1024xf32, #tpu.memory_space<vmem>>, vector<2x1024xf32>
    tpu.vector_store %arg2[%c0_5, %c0_6], %16 {strides = array<i32>} : memref<2x1024xf32, #tpu.memory_space<vmem>>, vector<2x1024xf32>,
    return
  }
  func.func @transform_0(%arg0: i32) -> (i32, i32) {
    %c0_i32 = arith.constant 0 : i32
    %c0_i32_0 = arith.constant 0 : i32
    return %arg0, %c0_i32 : i32, i32
  }
  func.func @transform_1(%arg0: i32) -> (i32, i32) {
    %c0_i32 = arith.constant 0 : i32
    %c0_i32_0 = arith.constant 0 : i32
    return %arg0, %c0_i32 : i32, i32
  }
}

</mosaic_0001>

<bundles_post_ra>
// kernel: tpu_custom_call.1
= control target key start
LH: loop header
LB: loop body
LE: loop exit
PB: predicated region body
PF: predicated region fallthrough
CT: control target
= control target key end

     0   :  { %6 = vsyncpa [#allocation3], 0  ;;  %s301_s0 = inlined_call_operand.hbm [shape: f32[2,1024], index: 0, kind: input, shape index: {}]   ;;  %s302_s1 = inlined_call_operand.hbm [shape: f32[2,1024], index: 1, kind: output, shape index: {}]  }
   0x1   :  { %7 = vsyncpa [#allocation4], 0  ;;  %s247_s6 = smov [#allocation2]   ;;  %s199_s10 = scalar_lea.hbm %s301_s0, 256 }
   0x2   :  { %s14_s7 = sshll.u32 %s247_s6, 4  ;;  %p200_p0 = scmp.ne.s32.totalorder %s301_s0, %s199_s10  ;;  %s15_s7 = int_to_ptr.vmem [resolvable:$true] %s14_s7 }
   0x3   :  { %p203_p1 = scmp.lt.u32.totalorder %s199_s10, %s301_s0 }
   0x5   :  { %p205_p2 = pnand %p203_p1, %p200_p0 }
   0x7   :  { %208 = shalt.err (!%p205_p2)
}
   0x8   :  { %s209_s15 = scalar_lea.vmem %s15_s7, 256  ;;  %p214_p4 = scmp.lt.s32.totalorder %s15_s7, %s15_s7 }
   0x9   :  { %p210_p3 = scmp.ne.s32.totalorder %s15_s7, %s209_s15  ;;  %p215_p5 = scmp.lt.s32.totalorder %s209_s15, %s209_s15 }
   0xb   :  { %p216_p6 = por %p215_p5, %p214_p4 }
   0xd   :  { %p217_p7 = pnand %p216_p6, %p210_p3 }
   0xf   :  { %220 = shalt.err (!%p217_p7)
}
  0x10   :  { %17 = dma.hbm_to_vmem [thread:$0]  %s301_s0, 256, %s15_s7, [#allocation3]  }
  0x11   :  { %243 = dma.done.wait [#allocation3], 256  }
  0x12   :  { %244 = vsyncadd [#allocation3], 4294967040  ;;  %v29_v0 = vlaneseq  ;;  %v248_v1 = vmov 1983009808   ;;  %v21_v6 = vld [vmem:[#allocation2] sm:$0xff]  ;;  %v22_v7 = vld [vmem:[#allocation2 + $0x8] sm:$0xff] }
  0x13   :  { %v27_v2 = vunpack.c.l.s4 %v248_v1  ;;  %v25_v8 = vcombine.high %v21_v6, %v21_v6  ;;  %vm67_vm0 = vcmask 1041408   ;;  %v42_v12 = vcombine.high %v22_v7, %v22_v7  ;;  %s250_s0 = smov [#allocation5]  }
  0x14   :  { %v30_v3 = vshrl.u32 %v29_v0, 7  ;;  %v249_v33 = vmov 269488144   ;;  %s182_s18 = sshll.u32 %s250_s0, 4  ;;  %s183_s18 = int_to_ptr.vmem [resolvable:$true] %s182_s18 }
  0x15   :  { %v28_v4 = vunpack.c.0.s8 %v27_v2  ;;  %v88_v34 = vunpack.c.l.s4 %v249_v33  ;;  %s221_s19 = scalar_lea.vmem %s183_s18, 256  ;;  %p226_p9 = scmp.lt.s32.totalorder %s183_s18, %s183_s18 }
  0x16   :  { %p222_p8 = scmp.ne.s32.totalorder %s183_s18, %s221_s19  ;;  %p227_p10 = scmp.lt.s32.totalorder %s221_s19, %s221_s19 }
  0x17   :  { %v31_v5 = vsub.s32 %v28_v4, %v30_v3  ;;  %v89_v35 = vunpack.c.0.s8 %v88_v34 }
  0x18   :  { %p228_p11 = por %p227_p10, %p226_p9 }
  0x19   :  { %v32_v9 = vrot.slane %v21_v6, %v31_v5  ;;  %v39_v10 = vrot.slane %v25_v8, %v31_v5  ;;  %v49_v13 = vrot.slane %v22_v7, %v31_v5  ;;  %v56_v19 = vrot.slane %v42_v12, %v31_v5 }
  0x1a   :  { %v92_v36 = vsub.s32 %v89_v35, %v30_v3  ;;  %p229_p12 = pnand %p228_p11, %p222_p8 }
  0x1b   :  { %v40_v11 = vcombine.high %v32_v9, %v32_v9  ;;  %v68_v14 = vsel %vm67_vm0, %v32_v9, 0.0  ;;  %v41_v15 = vcombine.high %v39_v10, %v39_v10  ;;  %v71_v17 = vsel %vm67_vm0, %v39_v10, 0.0 }
  0x1c   :  { %v57_v20 = vcombine.high %v49_v13, %v49_v13  ;;  %v75_v23 = vsel %vm67_vm0, %v49_v13, 0.0  ;;  %v58_v25 = vcombine.high %v56_v19, %v56_v19  ;;  %v79_v28 = vsel %vm67_vm0, %v56_v19, 0.0 }
  0x1d   :  { %v69_v16 = vsel %vm67_vm0, %v40_v11, 0.0  ;;  %v73_v21 = vsel %vm67_vm0, %v41_v15, 0.0 }
  0x1e   :  { %v70_v18 = vadd.f32 %v69_v16, %v68_v14  ;;  %v77_v26 = vsel %vm67_vm0, %v57_v20, 0.0  ;;  %v81_v30 = vsel %vm67_vm0, %v58_v25, 0.0 }
  0x20   :  { %v72_v22 = vadd.f32 %v71_v17, %v70_v18 }
  0x22   :  { %v74_v24 = vadd.f32 %v73_v21, %v72_v22 }
  0x24   :  { %v76_v27 = vadd.f32 %v75_v23, %v74_v24 }
  0x26   :  { %v78_v29 = vadd.f32 %v77_v26, %v76_v27 }
  0x28   :  { %v80_v31 = vadd.f32 %v79_v28, %v78_v29 }
  0x2a   :  { %v82_v32 = vadd.f32 %v81_v30, %v80_v31 }
  0x2c   :  { %83 = vadd.xlane.f32.xlu0 %v82_v32 }
  0xb9   :  { %v84_v37 = vpop.xlane.xlu0 %83 }
  0xba   :  { %v85_v38 = vmul.f32 0.0009765625, %v84_v37 }
  0xbc   :  { %v93_v39 = vrot.slane %v85_v38, %v92_v36 }
  0xbe   :  { %v95_v40 = vsub.f32 %v21_v6, %v93_v39  ;;  %v96_v41 = vsub.f32 %v22_v7, %v93_v39 }
  0xc0   :  { %v97_v42 = vmul.f32 %v95_v40, %v95_v40  ;;  %v98_v43 = vmul.f32 %v96_v41, %v96_v41 }
  0xc2   :  { %v101_v44 = vcombine.high %v97_v42, %v97_v42  ;;  %v108_v45 = vrot.slane %v97_v42, %v31_v5  ;;  %v125_v48 = vrot.slane %v98_v43, %v31_v5  ;;  %v118_v52 = vcombine.high %v98_v43, %v98_v43 }
  0xc4   :  { %v115_v46 = vrot.slane %v101_v44, %v31_v5  ;;  %v116_v47 = vcombine.high %v108_v45, %v108_v45  ;;  %v143_v49 = vsel %vm67_vm0, %v108_v45, 0.0  ;;  %v132_v56 = vrot.slane %v118_v52, %v31_v5 }
  0xc5   :  { %v133_v57 = vcombine.high %v125_v48, %v125_v48  ;;  %v150_v60 = vsel %vm67_vm0, %v125_v48, 0.0 }
  0xc6   :  { %v144_v50 = vsel %vm67_vm0, %v116_v47, 0.0  ;;  %v117_v51 = vcombine.high %v115_v46, %v115_v46  ;;  %v146_v54 = vsel %vm67_vm0, %v115_v46, 0.0  ;;  %v134_v62 = vcombine.high %v132_v56, %v132_v56 }
  0xc7   :  { %v145_v53 = vadd.f32 %v144_v50, %v143_v49  ;;  %v152_v63 = vsel %vm67_vm0, %v133_v57, 0.0  ;;  %v154_v1 = vsel %vm67_vm0, %v132_v56, 0.0 }
  0xc8   :  { %v148_v58 = vsel %vm67_vm0, %v117_v51, 0.0  ;;  %v156_v3 = vsel %vm67_vm0, %v134_v62, 0.0 }
  0xc9   :  { %v147_v55 = vadd.f32 %v146_v54, %v145_v53 }
  0xcb   :  { %v149_v59 = vadd.f32 %v148_v58, %v147_v55 }
  0xcd   :  { %v151_v61 = vadd.f32 %v150_v60, %v149_v59 }
  0xcf   :  { %v153_v0 = vadd.f32 %v152_v63, %v151_v61 }
  0xd1   :  { %v155_v2 = vadd.f32 %v154_v1, %v153_v0 }
  0xd3   :  { %v157_v4 = vadd.f32 %v156_v3, %v155_v2 }
  0xd5   :  { %158 = vadd.xlane.f32.xlu0 %v157_v4 }
 0x162   :  { %v159_v6 = vpop.xlane.xlu0 %158 }
 0x163   :  { %v160_v5 = vmul.f32 0.0009765625, %v159_v6 }
 0x165   :  { %v161_v7 = vadd.f32 1e-05, %v160_v5 }
 0x167   :  { %197 = vrsqrt.f32 %v161_v7 }
 0x171   :  { %v198_v8 = vpop.eup %197 }
 0x172   :  { %v170_v9 = vrot.slane %v198_v8, %v92_v36 }
 0x174   :  { %v172_v10 = vmul.f32 %v170_v9, %v95_v40  ;;  %v173_v11 = vmul.f32 %v170_v9, %v96_v41 }
 0x176   :  { %174 = vst [vmem:[#allocation5] sm:$0xff] %v172_v10  ;;  %175 = vst [vmem:[#allocation5 + $0x8] sm:$0xff] %v173_v11 }
 0x177   :  { %232 = shalt.err (!%p229_p12)
}
 0x178   :  { %s233_s22 = scalar_lea.hbm %s302_s1, 256 }
 0x179   :  { %p234_p13 = scmp.ne.s32.totalorder %s302_s1, %s233_s22  ;;  %p237_p0 = scmp.lt.u32.totalorder %s233_s22, %s302_s1 }
 0x17b   :  { %p239_p1 = pnand %p237_p0, %p234_p13 }
 0x17d   :  { %242 = shalt.err (!%p239_p1)
}
 0x17e   :  { %185 = dma.vmem_to_hbm [thread:$0]  %s183_s18, 256, %s302_s1, [#allocation4]  }
 0x17f   :  { %245 = dma.done.wait [#allocation4], 256  }
 0x180   :  { %246 = vsyncadd [#allocation4], 4294967040 }
 0x181   :  { %189 = vsyncpa [#allocation3], 1 }
 0x182   :  { %190 = vsyncpa [#allocation4], 1 }

</bundles_post_ra>
